<compile_context>
chip_gen: v7x
topology: tpu7x:2x2x1
jax: 0.10.0
libtpu: 0.0.40
codegen_flags: <defaults>
</compile_context>

<pallas_src>
import jax
import jax.numpy as jnp
from jax.experimental import pallas as pl
from jax.experimental.pallas import tpu as pltpu

EPS = 1e-10


def _l2norm_kernel(x_ref, w_ref, o_ref):
    # x_ref: (1, C, TILE_S)   w_ref: (C, 1)   o_ref: (1, C, TILE_S)
    x = x_ref[...].astype(jnp.float32)
    # Channel-wise L2 norm: reduction over the sublane (channel) axis.
    ssq = jnp.sum(x * x, axis=1, keepdims=True)            # (1, 1, TILE_S)
    norm = jnp.sqrt(ssq) + EPS
    inv = pl.reciprocal(norm, approx=False)                # per spatial lane
    w = w_ref[...].astype(jnp.float32)[None, :, :]         # (1, C, 1)
    o_ref[...] = (x * inv * w).astype(o_ref.dtype)


def l2norm(x_nchw: jax.Array, weight: jax.Array, *,
           vmem_buffer_budget_bytes: int = 2 * 1024 * 1024) -> jax.Array:
    """x_nchw: (B, C, H, W); weight: (C,). Returns (B, C, H, W)."""
    B, C, H, W = x_nchw.shape
    S = H * W

    # Free views — no HBM traffic, layout preserved (NCHW native).
    x3d = x_nchw.reshape(B, C, S)
    w2d = weight.reshape(C, 1).astype(jnp.float32)

    # Lane-dense spatial tile sized to a conservative per-buffer VMEM budget
    # (double-buffered input + output stays well under every generation's
    # scoped VMEM default).
    itemsize = jnp.dtype(x_nchw.dtype).itemsize
    if S < 128:
        tile_s = S                                   # full dim (allowed)
    else:
        budget_lanes = max(
            128, (vmem_buffer_budget_bytes // (C * itemsize)) // 128 * 128)
        tile_s = min(budget_lanes, (S // 128) * 128)  # multiple of 128
    n_s = pl.cdiv(S, tile_s)                          # edge block masked by Pallas

    out3d = pl.pallas_call(
        _l2norm_kernel,
        out_shape=jax.ShapeDtypeStruct((B, C, S), x_nchw.dtype),
        grid_spec=pltpu.PrefetchScalarGridSpec(
            num_scalar_prefetch=0,
            grid=(B, n_s),
            in_specs=[
                pl.BlockSpec((1, C, tile_s), lambda b, s: (b, 0, s)),
                pl.BlockSpec((C, 1), lambda b, s: (0, 0)),
            ],
            out_specs=pl.BlockSpec((1, C, tile_s), lambda b, s: (b, 0, s)),
        ),
        compiler_params=pltpu.CompilerParams(
            # Both axes independent -> sharded across the 2 TCs on v7x.
            dimension_semantics=("parallel", "parallel"),
            vmem_limit_bytes=32 * 1024 * 1024,
        ),
    )(x3d, w2d)

    return out3d.reshape(B, C, H, W)


def _reference(x_nchw, weight):
    norm = jnp.sqrt(jnp.sum(x_nchw * x_nchw, axis=1, keepdims=True)) + EPS
    return weight[None, :, None, None] * (x_nchw / norm)


if __name__ == "__main__":
    B, C, H, W = 2, 4, 16, 16
    scale = 20.0  # L2Norm(in_channels=C, scale=20) -> weight filled with 20

    key = jax.random.PRNGKey(0)
    x = jax.random.normal(key, (B, C, H, W), dtype=jnp.float32)

    # Deterministic parameter init, matching torch.nn.init.constant_(weight, scale)
    weight = jnp.full((C,), scale, dtype=jnp.float32)

    out = l2norm(x, weight)
    out = jax.block_until_ready(out)

    ref = _reference(x, weight)
    assert out.shape == (B, C, H, W)
    assert jnp.allclose(out, ref, atol=1e-5, rtol=1e-5), "mismatch vs reference"

    print("KERNEL_OK")
</pallas_src>

<mosaic_0001>
module attributes {stable_mosaic.version = 11 : i64} {
  func.func @_l2norm_kernel(%arg0: i32, %arg1: i32, %arg2: memref<1x4x256xf32, #tpu.memory_space<vmem>>, %arg3: memref<4x1xf32, #tpu.memory_space<vmem>>, %arg4: memref<1x4x256xf32, #tpu.memory_space<vmem>>) attributes {dimension_semantics = [#tpu.dimension_semantics<parallel>, #tpu.dimension_semantics<parallel>], iteration_bounds = array<i64: 2, 1>, scalar_prefetch = 0 : i64, scratch_operands = 0 : i64, tpu.core_type = #tpu.core_type<tc>, window_params = [{transform_indices = @transform_0, window_bounds = array<i64: 1, 4, 256>}, {pipeline_mode = #tpu.pipeline_mode<synchronous>, transform_indices = @transform_1, window_bounds = array<i64: 4, 1>}, {transform_indices = @transform_2, window_bounds = array<i64: 1, 4, 256>}]} {
    %c0 = arith.constant 0 : index
    %c0_0 = arith.constant 0 : index
    %c0_1 = arith.constant 0 : index
    %0 = vector.load %arg2[%c0, %c0_0, %c0_1] : memref<1x4x256xf32, #tpu.memory_space<vmem>>, vector<1x4x256xf32>
    %1 = arith.mulf %0, %0 : vector<1x4x256xf32>
    %cst = arith.constant dense<0.000000e+00> : vector<1x256xf32>
    %2 = vector.multi_reduction <add>, %1, %cst [1] : vector<1x4x256xf32> to vector<1x256xf32>
    %3 = vector.shape_cast %2 : vector<1x256xf32> to vector<1x1x256xf32>
    %4 = math.sqrt %3 : vector<1x1x256xf32>
    %cst_2 = arith.constant 1.000000e-10 : f32
    %5 = vector.broadcast %cst_2 : f32 to vector<1x1x256xf32>
    %6 = arith.addf %4, %5 : vector<1x1x256xf32>
    %7 = tpu.reciprocal %6 : vector<1x1x256xf32> -> vector<1x1x256xf32>
    %c0_3 = arith.constant 0 : index
    %c0_4 = arith.constant 0 : index
    %8 = vector.load %arg3[%c0_3, %c0_4] : memref<4x1xf32, #tpu.memory_space<vmem>>, vector<4x1xf32>
    %9 = vector.shape_cast %8 : vector<4x1xf32> to vector<1x4x1xf32>
    %10 = vector.broadcast %7 : vector<1x1x256xf32> to vector<1x4x256xf32>
    %11 = arith.mulf %0, %10 : vector<1x4x256xf32>
    %12 = vector.broadcast %9 : vector<1x4x1xf32> to vector<1x4x256xf32>
    %13 = arith.mulf %11, %12 : vector<1x4x256xf32>
    %c0_5 = arith.constant 0 : index
    %c0_6 = arith.constant 0 : index
    %c0_7 = arith.constant 0 : index
    %14 = vector.load %arg4[%c0_5, %c0_6, %c0_7] : memref<1x4x256xf32, #tpu.memory_space<vmem>>, vector<1x4x256xf32>
    tpu.vector_store %arg4[%c0_5, %c0_6, %c0_7], %13 {strides = array<i32>} : memref<1x4x256xf32, #tpu.memory_space<vmem>>, vector<1x4x256xf32>,
    return
  }
  func.func @transform_0(%arg0: i32, %arg1: i32) -> (i32, i32, i32) {
    %c0_i32 = arith.constant 0 : i32
    %c0_i32_0 = arith.constant 0 : i32
    return %arg0, %c0_i32, %arg1 : i32, i32, i32
  }
  func.func @transform_1(%arg0: i32, %arg1: i32) -> (i32, i32) {
    %c0_i32 = arith.constant 0 : i32
    %c0_i32_0 = arith.constant 0 : i32
    %c0_i32_1 = arith.constant 0 : i32
    return %c0_i32, %c0_i32_0 : i32, i32
  }
  func.func @transform_2(%arg0: i32, %arg1: i32) -> (i32, i32, i32) {
    %c0_i32 = arith.constant 0 : i32
    %c0_i32_0 = arith.constant 0 : i32
    return %arg0, %c0_i32, %arg1 : i32, i32, i32
  }
}

</mosaic_0001>

<bundles_post_ra>
// kernel: tpu_custom_call.1
= control target key start
LH: loop header
LB: loop body
LE: loop exit
PB: predicated region body
PF: predicated region fallthrough
CT: control target
= control target key end

     0   :  { %7 = vsyncpa [#allocation3], 0  ;;  %s741_s0 = inlined_call_operand.hbm [shape: f32[2,4,256], index: 0, kind: input, shape index: {}]   ;;  %s742_s1 = inlined_call_operand.vmem [shape: f32[4,1], index: 1, kind: input, shape index: {}]   ;;  %s743_s2 = inlined_call_operand.hbm [shape: f32[2,4,256], index: 2, kind: output, shape index: {}]  }
   0x1   :  { %9 = vsyncpa [#allocation3 + $0x1], 0 }
   0x2   :  { %10 = vsyncpa [#allocation4], 0 }
   0x3   :  { %12 = vsyncpa [#allocation4 + $0x1], 0  ;;  %s562_s9 = smov 0   ;;  %s564_s10 = smov 0  }
   0x4   :  { %s566_s11 = smov 0   ;;  %s568_s12 = smov 0  }
   0x5   :  { %s570_s13 = smov 0   ;;  %s572_s14 = smov 0  }
   0x6 LB: > { %s339_s15 = sadd.s32 4294967295, %s541_s14   ;;  %s340_s16 = sadd.s32 4294967294, %s541_s14   ;;  %s541_s14 = sphi %s572_s14, %s18_s14   ;;  %s537_s13 = sphi %s570_s13, %s759_s13   ;;  %s533_s12 = sphi %s568_s12, %s758_s12   ;;  %s529_s11 = sphi %s566_s11, %s757_s11   ;;  %s525_s10 = sphi %s564_s10, %s756_s10   ;;  %s521_s9 = sphi %s562_s9, %s755_s9  }
   0x7   : > { %s30_s17 = sadd.s32 1, %s537_s13  ;;  %s39_s18 = sadd.s32 1, %s529_s11 }
   0x8   : > { %p32_p0 = scmp.ge.s32.totalorder %s30_s17, 2  ;;  %p46_p1 = scmp.ne.s32.totalorder %s529_s11, %s525_s10 }
   0x9   : > { %p47_p2 = scmp.eq.s32.totalorder %s541_s14, 0  ;;  %p52_p3 = scmp.ne.s32.totalorder %s525_s10, %s521_s9 }
   0xa   : > { %s761_s17 = smov (%p32_p0, %s30_s17), 0  ;;  %p53_p5 = scmp.eq.s32.totalorder %s339_s15, 0 }
   0xb   : > { %p603_p4 = por %p47_p2, %p46_p1  ;;  %s34_s20 = ssub.s32 %s537_s13, %s761_s17 }
   0xc   : > { %p99_p6 = scmp.eq.s32.totalorder %s339_s15, 1  ;;  %p37_p7 = scmp.eq.s32.totalorder %s34_s20, 0 }
   0xd   : > { %p609_p8 = por %p53_p5, %p52_p3  ;;  %p105_p10 = scmp.eq.s32.totalorder %s340_s16, 1 }
   0xe   : > { %p613_p9 = por %p99_p6, %p46_p1  ;;  %p368_p13 = scmp.lt.s32.totalorder %s541_s14, 2 }
   0xf   : > { %s618_s23 = scalar_select %p37_p7, %s529_s11, %s39_s18  }
  0x10   : > { %s747_s22 = scalar_select %p613_p9, 1, 0 }
  0x11   : > { %p620_p11 = por %p105_p10, %p52_p3  ;;  %s128_s25 = sand.u32 1, %s529_s11  }
  0x12   : > { %s343_s26 = sshll.u32 %s128_s25, 3  ;;  %s354_s27 = sshll.u32 %s537_s13, 7 }
  0x13   : > { %s748_s24 = scalar_select %p620_p11, 1, 0 }
  0x14   : > { %s631_s30 = scalar_lea.hbm %s741_s0, %s354_s27  ;;  %s132_s3 = scalar_lea.vmem [#allocation2], %s343_s26 }
  0x15   : > { %s142_s4 = sshll.u32 %s132_s3, 4  ;;  %p637_p0 = pnand %p368_p13, %p603_p4  ;;  %s633_s4 = int_to_ptr.vmem [resolvable:$true] %s142_s4 }
  0x16   : > { %s129_s6 = scalar_lea.sflag [#allocation3], %s128_s25  ;;  %s429_s7 = scalar_lea.hbm %s631_s30, 128 }
  0x17   : > { %p430_p3 = scmp.ne.s32.totalorder %s631_s30, %s429_s7  ;;  %p431_p5 = pneg %p637_p0 }
  0x18   : > { %s434_s16 = scalar_lea.hbm %s741_s0, 256  ;;  %p435_p4 = scmp.lt.u32.totalorder %s631_s30, %s741_s0 }
  0x19   : > { %p432_p6 = pnand %p431_p5, %p430_p3  ;;  %p436_p10 = scmp.lt.u32.totalorder %s434_s16, %s429_s7 }
  0x1a   : > { %p438_p12 = scmp.lt.u32.totalorder %s429_s7, %s631_s30 }
  0x1b   : > { %p433_p7 = pneg %p432_p6  ;;  %p437_p13 = por %p436_p10, %p435_p4 }
  0x1d   : > { %p439_p1 = por %p438_p12, %p437_p13 }
  0x1f   : > { %p440_p2 = pnand %p439_p1, %p433_p7 }
  0x21   : > { %443 = shalt.err (!%p440_p2)
}
  0x22   : > { %s444_s20 = scalar_lea.vmem %s633_s4, 128  ;;  %s543_s25 = smov [#allocation2]  }
  0x23   : > { %p445_p3 = scmp.ne.s32.totalorder %s633_s4, %s444_s20  ;;  %s449_s26 = sshll.u32 %s543_s25, 4  ;;  %s450_s26 = int_to_ptr.vmem [resolvable:$false] %s449_s26 }
  0x24   : > { %s451_s27 = scalar_lea.vmem %s450_s26, 256  ;;  %p452_p9 = scmp.lt.s32.totalorder %s633_s4, %s450_s26 }
  0x25   : > { %p447_p6 = pnand %p445_p3, %p431_p5  ;;  %p453_p4 = scmp.lt.s32.totalorder %s451_s27, %s444_s20 }
  0x27   : > { %p448_p11 = pneg %p447_p6  ;;  %p454_p10 = por %p453_p4, %p452_p9 }
  0x29   : > { %p455_p12 = pnand %p454_p10, %p448_p11 }
  0x2b   : > { %458 = shalt.err (!%p455_p12)
}
  0x2c   : > { %363 = dma.hbm_to_vmem [thread:$0]  (!%p637_p0), %s631_s30, 128, %s633_s4, %s129_s6  }
  0x2d   : > { %p750_p1 = scmp.lt.s32.totalorder %s541_s14, 3  ;;  %p751_p2 = scmp.ge.s32.totalorder %s541_s14, 1 }
  0x2f   : > { %p148_p5 = pnand %p751_p2, %p750_p1 }
  0x30   : > { %s673_s28 = sand.u32 (!%p148_p5), 1, %s525_s10  }
  0x31   : > { %151 = sbr.rel (%p148_p5) target bundleno = 205 (0xcd), region = 28  ;;  %s347_s29 = sshll.u32 (!%p148_p5), %s673_s28, 3 }
  0x32   : > { %s154_s3 = scalar_lea.sflag (!%p148_p5), [#allocation3], %s673_s28  ;;  %s157_s5 = scalar_lea.vmem (!%p148_p5), [#allocation2], %s347_s29 }
  0x38   : > { %512 = dma.done.wait (%p609_p8), %s154_s3, 128  }
  0x39   : > { %514 = vsyncadd (%p609_p8), %s154_s3, 4294967168  ;;  %v544_v0 = vmov 0   ;;  %v218_v1 = vld [vmem:[%s742_s1] sm:$0xf]  ;;  %vm185_vm0 = vcmask 1043456   ;;  %v231_v33 = vlaneseq  ;;  %s355_s21 = sshll.u32 %s533_s12, 7 }
  0x3a   : > { %420 = vset.pattern.permute.xlu0 %v544_v0  ;;  %v180_v2 = vld [vmem:[%s157_s5] sm:$0xff]  ;;  %v545_v31 = vmov 839922192   ;;  %s177_s6 = scalar_lea.vmem [#allocation5], %s347_s29  ;;  %s692_s16 = scalar_lea.hbm %s743_s2, %s355_s21 }
  0x3b   : > { %226 = vperm.xlu0 %420, %v218_v1   ;;  %v181_v3 = vmul.f32 %v180_v2, %v180_v2  ;;  %v229_v32 = vunpack.c.l.s4 %v545_v31  ;;  %v232_v37 = vshrl.u32 %v231_v33, 7  ;;  %s255_s7 = sshll.u32 %s177_s6, 4  ;;  %s239_s18 = scalar_lea.sflag [#allocation4], %s673_s28  ;;  %s694_s7 = int_to_ptr.vmem [resolvable:$true] %s255_s7 }
  0x3c   : > { %s459_s19 = scalar_lea.vmem %s694_s7, 128  ;;  %p752_p9 = scmp.ne.s32.totalorder %s747_s22, 0 }
  0x3d   : > { %v183_v4 = vcombine.high %v181_v3, %v181_v3  ;;  %v186_v5 = vsel %vm185_vm0, %v181_v3, 0.0  ;;  %v230_v36 = vunpack.c.0.s8 %v229_v32  ;;  %p460_p8 = scmp.ne.s32.totalorder %s694_s7, %s459_s19  ;;  %s546_s12 = smov [#allocation5]  }
  0x3e   : > { %v187_v7 = vrot.slane %v186_v5, 4  ;;  %s463_s20 = sshll.u32 %s546_s12, 4  ;;  %s464_s20 = int_to_ptr.vmem [resolvable:$false] %s463_s20 }
  0x3f   : > { %v193_v6 = vsel %vm185_vm0, %v183_v4, 0.0  ;;  %v233_v39 = vsub.s32 %v230_v36, %v232_v37  ;;  %p461_p11 = pnand %p460_p8, %p752_p9  ;;  %s465_s25 = scalar_lea.vmem %s464_s20, 256 }
  0x40   : > { %v194_v8 = vrot.slane %v193_v6, 4  ;;  %v188_v9 = vadd.f32 %v187_v7, %v186_v5  ;;  %p466_p7 = scmp.lt.s32.totalorder %s694_s7, %s464_s20  ;;  %p467_p13 = scmp.lt.s32.totalorder %s465_s25, %s459_s19 }
  0x41   : > { %p462_p0 = pneg %p461_p11 }
  0x42   : > { %v195_v10 = vadd.f32 %v194_v8, %v193_v6  ;;  %v189_v11 = vrot.slane %v188_v9, 2  ;;  %p468_p3 = por %p467_p13, %p466_p7 }
  0x44   : > { %v196_v12 = vrot.slane %v195_v10, 2  ;;  %v190_v13 = vadd.f32 %v189_v11, %v188_v9  ;;  %p469_p6 = pnand %p468_p3, %p462_p0 }
  0x46   : > { %v197_v14 = vadd.f32 %v196_v12, %v195_v10  ;;  %v191_v15 = vrot.slane %v190_v13, 1 }
  0x48   : > { %v198_v16 = vrot.slane %v197_v14, 1  ;;  %v192_v17 = vadd.f32 %v191_v15, %v190_v13 }
  0x4a   : > { %v199_v18 = vadd.f32 %v198_v16, %v197_v14  ;;  %421 = vrsqrt.f32 %v192_v17  ;;  %vm202_vm1 = vcmp.eq.f32.partialorder %v192_v17, inf  ;;  %v205_v23 = vand.u32 2147483648, %v192_v17 }
  0x4b   : > { %vm204_vm3 = vcmp.eq.f32.partialorder %v192_v17, 0.0 }
  0x4c   : > { %423 = vrsqrt.f32 %v199_v18  ;;  %vm209_vm2 = vcmp.eq.f32.partialorder %v199_v18, inf  ;;  %v212_v25 = vand.u32 2147483648, %v199_v18  ;;  %vm211_vm4 = vcmp.eq.f32.partialorder %v199_v18, 0.0 }
  0x54   : > { %v422_v19 = vpop.eup %421 }
  0x55   : > { %v201_v21 = vmul.f32 %v422_v19, %v192_v17 }
  0x56   : > { %v424_v20 = vpop.eup %423 }
  0x57   : > { %v208_v22 = vmul.f32 %v424_v20, %v199_v18  ;;  %v203_v24 = vsel %vm202_vm1, %v192_v17, %v201_v21 }
  0x58   : > { %v206_v27 = vsel %vm204_vm3, %v205_v23, %v203_v24 }
  0x59   : > { %v210_v26 = vsel %vm209_vm2, %v199_v18, %v208_v22  ;;  %v214_v29 = vadd.f32 1e-10, %v206_v27 }
  0x5a   : > { %v213_v28 = vsel %vm211_vm4, %v212_v25, %v210_v26 }
  0x5b   : > { %v215_v30 = vadd.f32 1e-10, %v213_v28  ;;  %425 = vrcp.f32 %v214_v29 }
  0x5d   : > { %427 = vrcp.f32 %v215_v30 }
  0x65   : > { %v426_v34 = vpop.eup %425 }
  0x67   : > { %v428_v35 = vpop.eup %427 }
  0x68   : > { %v221_v38 = vcombine.low %v426_v34, %v428_v35 }
  0x6a   : > { %v223_v40 = vmul.f32 %v221_v38, %v180_v2 }
  0xba   : > { %v227_v41 = vpop.permute.xlu0 %226 }
  0xbb   : > { %v234_v42 = vrot.slane %v227_v41, %v233_v39 }
  0xbd   : > { %v236_v43 = vmul.f32 %v234_v42, %v223_v40 }
  0xbf   : > { %237 = vst [vmem:[%s177_s6] sm:$0xff] %v236_v43 }
  0xc0   : > { %472 = shalt.err (!%p469_p6)
}
  0xc1   : > { %s473_s26 = scalar_lea.hbm %s692_s16, 128  ;;  %s477_s29 = scalar_lea.hbm %s743_s2, 256 }
  0xc2   : > { %p474_p4 = scmp.ne.s32.totalorder %s692_s16, %s473_s26  ;;  %p478_p1 = scmp.lt.u32.totalorder %s692_s16, %s743_s2 }
  0xc3   : > { %p479_p2 = scmp.lt.u32.totalorder %s477_s29, %s473_s26  ;;  %p481_p8 = scmp.lt.u32.totalorder %s473_s26, %s692_s16 }
  0xc4   : > { %p475_p10 = pnand %p474_p4, %p752_p9 }
  0xc5   : > { %p480_p5 = por %p479_p2, %p478_p1 }
  0xc6   : > { %p476_p12 = pneg %p475_p10 }
  0xc7   : > { %p482_p11 = por %p481_p8, %p480_p5 }
  0xc9   : > { %p483_p0 = pnand %p482_p11, %p476_p12 }
  0xcb   : > { %486 = shalt.err (!%p483_p0)
}
  0xcc   : > { %358 = dma.vmem_to_hbm [thread:$0]  (%p752_p9), %s694_s7, 128, %s692_s16, %s239_s18  }
  0xcd PF: > { %s267_s30 = sand.u32 1, %s521_s9   ;;  %p753_p7 = scmp.ne.s32.totalorder %s748_s24, 0 }
  0xce   : > { %p754_p13 = scmp.ge.s32.totalorder %s541_s14, 2  ;;  %s268_s4 = scalar_lea.sflag [#allocation4], %s267_s30 }
  0xd0   : > { %p365_p3 = pnand %p754_p13, %p753_p7 }
  0xd2   : > { %516 = dma.done.wait (!%p365_p3), %s268_s4, 128  }
  0xd3   : > { %518 = vsyncadd (!%p365_p3), %s268_s4, 4294967168  ;;  %s18_s14 = sadd.s32 1, %s541_s14   ;;  %s755_s9 = smov %s525_s10 }
  0xd4   : > { %p15_p6 = scmp.ge.s32.totalorder %s18_s14, 4   ;;  %s756_s10 = smov %s529_s11 }
  0xd5   : > { %s757_s11 = smov %s618_s23  ;;  %s758_s12 = smov %s537_s13 }
  0xd6   : > { %s759_s13 = smov %s761_s17  ;;  %17 = sbr.rel (!%p15_p6) target bundleno = 6 (0x6), region = 73 }
  0xdd   :  { %273 = vsyncpa [#allocation3], 1 }
  0xde   :  { %275 = vsyncpa [#allocation3 + $0x1], 1 }
  0xdf   :  { %276 = vsyncpa [#allocation4], 1 }
  0xe0   :  { %278 = vsyncpa [#allocation4 + $0x1], 1 }

</bundles_post_ra>
